<compile_context>
chip_gen: v6e
topology: v6e:2x2x1
jax: 0.10.0
libtpu: 0.0.40
codegen_flags: <defaults>
</compile_context>

<pallas_src>
import jax
import jax.numpy as jnp
from jax.experimental import pallas as pl
from jax.experimental.pallas import tpu as pltpu


def _se_layer_kernel(x_ref, w1_ref, w2_ref, o_ref):
    # x_ref : (Bt, C, L)   activation slab (C on sublanes, L on lanes)
    # w1_ref: (C, Cr)      fc1 weight, pre-transposed (Linear(C, C//r, bias=False))
    # w2_ref: (Cr, C)      fc2 weight, pre-transposed (Linear(C//r, C, bias=False))
    # o_ref : (Bt, C, L)
    x = x_ref[...]

    # ---- squeeze: AdaptiveAvgPool1d(1) == global mean over L (lane reduce) ----
    # f32 accumulation without materializing an f32 copy of the whole slab.
    y = jnp.mean(x, axis=-1, dtype=jnp.float32)                          # (Bt, C)

    # ---- excitation: fc1 -> SiLU -> fc2 -> sigmoid (tiny MXU calls) ----
    y = jnp.dot(y, w1_ref[...], preferred_element_type=jnp.float32)      # (Bt, Cr)
    y = y * jax.nn.sigmoid(y)                                            # SiLU
    y = jax.nn.sigmoid(
        jnp.dot(y, w2_ref[...], preferred_element_type=jnp.float32))     # (Bt, C)

    # ---- scale: broadcast per-(b, c) gate over L and rescale in native dtype ----
    gate = y.astype(x.dtype)[:, :, None]                                 # (Bt, C, 1)
    o_ref[...] = (x * gate).astype(o_ref.dtype)


def _pick_b_tile(B, C, L, itemsize, vmem_budget_bytes=16 * 1024 * 1024):
    """Largest divisor of B whose double-buffered in+out slabs fit the budget,
    preferring >= 2 grid steps when B > 1."""
    per_batch = 2 * C * L * itemsize            # one input + one output row of the slab
    divisors = [t for t in range(1, B + 1) if B % t == 0]
    # Fit budget (x2 for double-buffered input + output pipelines).
    fitting = [t for t in divisors if 2 * t * per_batch <= vmem_budget_bytes] or [1]
    b_tile = max(fitting)
    # Prefer at least 2 grid steps so the pipeline / megacore has work to overlap.
    if B // b_tile < 2:
        smaller = [t for t in fitting if B // t >= 2]
        if smaller:
            b_tile = max(smaller)
    return b_tile


def se_layer_forward(x, se_w1, se_w2, *, b_tile=None):
    """SELayer forward.

    x     : (B, C, L)   activations, PyTorch Conv1d layout.
    se_w1 : (C//r, C)   nn.Linear(C, C//r, bias=False).weight
    se_w2 : (C, C//r)   nn.Linear(C//r, C, bias=False).weight
    """
    B, C, L = x.shape
    Cr = se_w1.shape[0]
    assert se_w1.shape == (Cr, C) and se_w2.shape == (C, Cr)

    itemsize = jnp.dtype(x.dtype).itemsize
    if b_tile is None:
        b_tile = _pick_b_tile(B, C, L, itemsize)
    assert B % b_tile == 0

    # Glue: transpose the Linear weights once so the in-kernel dots are row-major.
    w1t = jnp.asarray(se_w1).T                                  # (C, Cr)
    w2t = jnp.asarray(se_w2).T                                  # (Cr, C)

    cost = pl.CostEstimate(
        flops=2 * B * C * L + 4 * B * C * Cr,                   # pool + scale + 2 fc
        transcendentals=B * (C + Cr),                           # SiLU + gate sigmoids
        bytes_accessed=2 * B * C * L * itemsize + 2 * C * Cr * 4,
    )

    return pl.pallas_call(
        _se_layer_kernel,
        out_shape=jax.ShapeDtypeStruct((B, C, L), x.dtype),
        grid_spec=pltpu.PrefetchScalarGridSpec(
            num_scalar_prefetch=0,
            grid=(B // b_tile,),
            in_specs=[
                pl.BlockSpec((b_tile, C, L), lambda b: (b, 0, 0)),
                pl.BlockSpec((C, Cr), lambda b: (0, 0)),        # weights stay resident
                pl.BlockSpec((Cr, C), lambda b: (0, 0)),
            ],
            out_specs=pl.BlockSpec((b_tile, C, L), lambda b: (b, 0, 0)),
        ),
        compiler_params=pltpu.CompilerParams(
            dimension_semantics=("parallel",)),
        cost_estimate=cost,
    )(x, w1t, w2t)


def ref_forward(x, se_w1, se_w2):
    """Pure-JAX reference mirroring PyTorch SELayer.forward (eval mode)."""
    y = x.mean(axis=2)                    # (B, C)  == AdaptiveAvgPool1d(1).view(b, c)
    y = y @ se_w1.T                       # Linear(C, C//r, bias=False)
    y = y * jax.nn.sigmoid(y)             # SiLU
    y = jax.nn.sigmoid(y @ se_w2.T)       # Linear(C//r, C, bias=False) + Sigmoid
    return x * y[:, :, None]              # x * y.expand_as(x)


if __name__ == "__main__":
    B, C, L, reduction = 4, 64, 256, 16
    Cr = C // reduction
    key = jax.random.PRNGKey(0)
    kx, k1, k2 = jax.random.split(key, 3)
    x = jax.random.normal(kx, (B, C, L), jnp.float32)
    se_w1 = 0.3 * jax.random.normal(k1, (Cr, C), jnp.float32)   # Linear(C, C//r)
    se_w2 = 0.3 * jax.random.normal(k2, (C, Cr), jnp.float32)   # Linear(C//r, C)

    out = jax.block_until_ready(se_layer_forward(x, se_w1, se_w2))
    ref = jax.block_until_ready(ref_forward(x, se_w1, se_w2))
    assert out.shape == (B, C, L)
    assert jnp.allclose(out, ref, rtol=1e-4, atol=1e-4), float(jnp.max(jnp.abs(out - ref)))
    print("KERNEL_OK")
</pallas_src>

<mosaic_0001>
module attributes {stable_mosaic.version = 11 : i64} {
  func.func @_se_layer_kernel(%arg0: i32, %arg1: memref<2x64x256xf32, #tpu.memory_space<vmem>>, %arg2: memref<64x4xf32, #tpu.memory_space<vmem>>, %arg3: memref<4x64xf32, #tpu.memory_space<vmem>>, %arg4: memref<2x64x256xf32, #tpu.memory_space<vmem>>) attributes {dimension_semantics = [#tpu.dimension_semantics<parallel>], iteration_bounds = array<i64: 2>, scalar_prefetch = 0 : i64, scratch_operands = 0 : i64, tpu.core_type = #tpu.core_type<tc>, window_params = [{transform_indices = @transform_0, window_bounds = array<i64: 2, 64, 256>}, {pipeline_mode = #tpu.pipeline_mode<synchronous>, transform_indices = @transform_1, window_bounds = array<i64: 64, 4>}, {pipeline_mode = #tpu.pipeline_mode<synchronous>, transform_indices = @transform_2, window_bounds = array<i64: 4, 64>}, {transform_indices = @transform_3, window_bounds = array<i64: 2, 64, 256>}]} {
    %c0 = arith.constant 0 : index
    %c0_0 = arith.constant 0 : index
    %c0_1 = arith.constant 0 : index
    %0 = vector.load %arg1[%c0, %c0_0, %c0_1] : memref<2x64x256xf32, #tpu.memory_space<vmem>>, vector<2x64x256xf32>
    %cst = arith.constant dense<0.000000e+00> : vector<2x64xf32>
    %1 = vector.multi_reduction <add>, %0, %cst [2] : vector<2x64x256xf32> to vector<2x64xf32>
    %cst_2 = arith.constant 2.560000e+02 : f32
    %2 = vector.broadcast %cst_2 : f32 to vector<2x64xf32>
    %3 = arith.divf %1, %2 : vector<2x64xf32>
    %c0_3 = arith.constant 0 : index
    %c0_4 = arith.constant 0 : index
    %4 = vector.load %arg2[%c0_3, %c0_4] : memref<64x4xf32, #tpu.memory_space<vmem>>, vector<64x4xf32>
    %cst_5 = arith.constant dense<0.000000e+00> : vector<2x4xf32>
    %5 = tpu.matmul %3, %4, %cst_5 {dimension_numbers = #tpu.dot_dimension_numbers<[1], [0], [0], [1], [0, 0, 1, 1], [], []>} : vector<2x64xf32>, vector<64x4xf32>, vector<2x4xf32> -> vector<2x4xf32>
    %6 = arith.negf %5 : vector<2x4xf32>
    %7 = math.exp %6 : vector<2x4xf32>
    %cst_6 = arith.constant 1.000000e+00 : f32
    %8 = vector.broadcast %cst_6 : f32 to vector<2x4xf32>
    %9 = arith.addf %8, %7 : vector<2x4xf32>
    %10 = arith.divf %8, %9 : vector<2x4xf32>
    %11 = arith.mulf %5, %10 : vector<2x4xf32>
    %c0_7 = arith.constant 0 : index
    %c0_8 = arith.constant 0 : index
    %12 = vector.load %arg3[%c0_7, %c0_8] : memref<4x64xf32, #tpu.memory_space<vmem>>, vector<4x64xf32>
    %cst_9 = arith.constant dense<0.000000e+00> : vector<2x64xf32>
    %13 = tpu.matmul %11, %12, %cst_9 {dimension_numbers = #tpu.dot_dimension_numbers<[1], [0], [0], [1], [0, 0, 1, 1], [], []>} : vector<2x4xf32>, vector<4x64xf32>, vector<2x64xf32> -> vector<2x64xf32>
    %14 = arith.negf %13 : vector<2x64xf32>
    %15 = math.exp %14 : vector<2x64xf32>
    %cst_10 = arith.constant 1.000000e+00 : f32
    %16 = vector.broadcast %cst_10 : f32 to vector<2x64xf32>
    %17 = arith.addf %16, %15 : vector<2x64xf32>
    %18 = arith.divf %16, %17 : vector<2x64xf32>
    %19 = vector.shape_cast %18 : vector<2x64xf32> to vector<2x64x1xf32>
    %20 = vector.broadcast %19 : vector<2x64x1xf32> to vector<2x64x256xf32>
    %21 = arith.mulf %0, %20 : vector<2x64x256xf32>
    %c0_11 = arith.constant 0 : index
    %c0_12 = arith.constant 0 : index
    %c0_13 = arith.constant 0 : index
    %22 = vector.load %arg4[%c0_11, %c0_12, %c0_13] : memref<2x64x256xf32, #tpu.memory_space<vmem>>, vector<2x64x256xf32>
    tpu.vector_store %arg4[%c0_11, %c0_12, %c0_13], %21 {strides = array<i32>} : memref<2x64x256xf32, #tpu.memory_space<vmem>>, vector<2x64x256xf32>,
    return
  }
  func.func @transform_0(%arg0: i32) -> (i32, i32, i32) {
    %c0_i32 = arith.constant 0 : i32
    %c0_i32_0 = arith.constant 0 : i32
    %c0_i32_1 = arith.constant 0 : i32
    return %arg0, %c0_i32, %c0_i32_0 : i32, i32, i32
  }
  func.func @transform_1(%arg0: i32) -> (i32, i32) {
    %c0_i32 = arith.constant 0 : i32
    %c0_i32_0 = arith.constant 0 : i32
    %c0_i32_1 = arith.constant 0 : i32
    return %c0_i32, %c0_i32_0 : i32, i32
  }
  func.func @transform_2(%arg0: i32) -> (i32, i32) {
    %c0_i32 = arith.constant 0 : i32
    %c0_i32_0 = arith.constant 0 : i32
    %c0_i32_1 = arith.constant 0 : i32
    return %c0_i32, %c0_i32_0 : i32, i32
  }
  func.func @transform_3(%arg0: i32) -> (i32, i32, i32) {
    %c0_i32 = arith.constant 0 : i32
    %c0_i32_0 = arith.constant 0 : i32
    %c0_i32_1 = arith.constant 0 : i32
    return %arg0, %c0_i32, %c0_i32_0 : i32, i32, i32
  }
}

</mosaic_0001>

<bundles_post_ra>
// kernel: tpu_custom_call.1
= control target key start
LH: loop header
LB: loop body
LE: loop exit
PB: predicated region body
PF: predicated region fallthrough
CT: control target
= control target key end

     0   :  { %8 = vsyncpa [#allocation3], 0  ;;  %s1444_s0 = inlined_call_operand.hbm [shape: f32[4,64,256], index: 0, kind: input, shape index: {}]   ;;  %s1445_s1 = inlined_call_operand.vmem [shape: f32[64,4], index: 1, kind: input, shape index: {}]   ;;  %s1446_s2 = inlined_call_operand.vmem [shape: f32[4,64], index: 2, kind: input, shape index: {}]   ;;  %s1447_s3 = inlined_call_operand.hbm [shape: f32[4,64,256], index: 3, kind: output, shape index: {}]  }
   0x1   :  { %10 = vsyncpa [#allocation3 + $0x1], 0 }
   0x2   :  { %11 = vsyncpa [#allocation4], 0 }
   0x3   :  { %13 = vsyncpa [#allocation4 + $0x1], 0  ;;  %s1038_s12 = smov 0   ;;  %s1040_s13 = smov 0  }
   0x4   :  { %s1042_s14 = smov 0   ;;  %s1044_s15 = smov 0  }
   0x5 LB: > { %s1059_s16 = sadd.s32 4294967295, %s1008_s15   ;;  %s796_s17 = sadd.s32 4294967294, %s1008_s15   ;;  %s1008_s15 = sphi %s1044_s15, %s1483_s15   ;;  %s1004_s14 = sphi %s1042_s14, %s1482_s14   ;;  %s1000_s13 = sphi %s1040_s13, %s1481_s13   ;;  %s996_s12 = sphi %s1038_s12, %s1480_s12  }
   0x6   : > { %s1063_s18 = sadd.s32 1, %s1008_s15   ;;  %s26_s19 = sadd.s32 1, %s1004_s14 }
   0x7   : > { %s23_s20 = ssub.s32 %s1008_s15, %s1063_s18  ;;  %p33_p0 = scmp.ne.s32.totalorder %s1004_s14, %s1000_s13 }
   0x8   : > { %p24_p1 = scmp.eq.s32.totalorder %s23_s20, 0  ;;  %p34_p2 = scmp.eq.s32.totalorder %s1008_s15, 0 }
   0x9   : > { %p39_p3 = scmp.ne.s32.totalorder %s1000_s13, %s996_s12  ;;  %p40_p4 = scmp.eq.s32.totalorder %s1059_s16, 0 }
   0xa   : > { %s1075_s21 = scalar_select %p24_p1, %s1004_s14, %s26_s19  }
   0xb   : > { %p1077_p5 = por %p34_p2, %p33_p0  ;;  %p1081_p6 = por %p40_p4, %p39_p3 }
   0xc   : > { %p105_p7 = scmp.eq.s32.totalorder %s1059_s16, 1  ;;  %p111_p8 = scmp.eq.s32.totalorder %s796_s17, 1 }
   0xd   : > { %s1458_s23 = scalar_select %p1081_p6, 1, 0 }
   0xe   : > { %p868_p10 = scmp.lt.s32.totalorder %s1008_s15, 2  ;;  %p1088_p11 = por %p105_p7, %p33_p0 }
   0xf   : > { %p1092_p12 = por %p111_p8, %p39_p3  ;;  %s137_s26 = sand.u32 1, %s1004_s14  }
  0x10   : > { %s1459_s24 = scalar_select %p1088_p11, 1, 0 }
  0x11   : > { %s1460_s25 = scalar_select %p1092_p12, 1, 0 }
  0x12   : > { %s818_s27 = sshll.u32 %s1008_s15, 12  ;;  %s799_s28 = sshll.u32 %s137_s26, 8 }
  0x13   : > { %s1101_s4 = scalar_lea.hbm %s1444_s0, %s818_s27  ;;  %s141_s5 = scalar_lea.vmem [#allocation2], %s799_s28 }
  0x14   : > { %s149_s6 = sshll.u32 %s141_s5, 4  ;;  %p1105_p13 = pnand %p868_p10, %p1077_p5  ;;  %s1109_s6 = int_to_ptr.vmem [resolvable:$true] %s149_s6 }
  0x15   : > { %s1111_s8 = scalar_lea.sflag [#allocation3], %s137_s26  ;;  %s916_s9 = scalar_lea.hbm %s1101_s4, 4096 }
  0x16   : > { %p917_p0 = scmp.ne.s32.totalorder %s1101_s4, %s916_s9  ;;  %p918_p1 = pneg %p1105_p13 }
  0x17   : > { %s921_s17 = scalar_lea.hbm %s1444_s0, 8192  ;;  %p922_p4 = scmp.lt.s32.totalorder %s1101_s4, %s1444_s0 }
  0x18   : > { %p919_p2 = pnand %p918_p1, %p917_p0  ;;  %p923_p5 = scmp.lt.s32.totalorder %s921_s17, %s916_s9 }
  0x1a   : > { %p920_p3 = pneg %p919_p2  ;;  %p924_p7 = por %p923_p5, %p922_p4 }
  0x1c   : > { %p925_p8 = pnand %p924_p7, %p920_p3 }
  0x1e   : > { %928 = shalt.err (!%p925_p8)
}
  0x1f   : > { %s929_s22 = scalar_lea.vmem %s1109_s6, 4096  ;;  %s1010_s26 = smov [#allocation2]  }
  0x20   : > { %p930_p10 = scmp.ne.s32.totalorder %s1109_s6, %s929_s22  ;;  %s934_s27 = sshll.u32 %s1010_s26, 4  ;;  %s935_s27 = int_to_ptr.vmem [resolvable:$false] %s934_s27 }
  0x21   : > { %s936_s28 = scalar_lea.vmem %s935_s27, 8192  ;;  %p937_p2 = scmp.lt.s32.totalorder %s1109_s6, %s935_s27 }
  0x22   : > { %p932_p9 = pnand %p930_p10, %p918_p1  ;;  %p938_p12 = scmp.lt.s32.totalorder %s936_s28, %s929_s22 }
  0x24   : > { %p933_p0 = pneg %p932_p9  ;;  %p939_p11 = por %p938_p12, %p937_p2 }
  0x26   : > { %p940_p6 = pnand %p939_p11, %p933_p0 }
  0x28   : > { %943 = shalt.err (!%p940_p6)
}
  0x29   : > { %s1011_s29 = smov 256   ;;  %s1012_s30 = smov 16  }
  0x2a   : > { %863 = dma.hbm_to_vmem [thread:$0]  (!%p1105_p13), %s1101_s4, 4096, %s1109_s6, %s1111_s8, %s1011_s29, %s1011_s29, %s1012_s30  }
  0x2b   : > { %p803_p9 = scmp.ge.s32.totalorder %s1008_s15, 1  ;;  %p157_p1 = scmp.lt.s32.totalorder %s1008_s15, 3 }
  0x2d   : > { %p158_p3 = pnand %p803_p9, %p157_p1 }
  0x2f   : > { %161 = sbr.rel (%p158_p3) target bundleno = 849 (0x351), region = 32 }
  0x34   : > { %s1135_s5 = sand.u32 1, %s1000_s13   ;;  %p1462_p6 = scmp.ne.s32.totalorder %s1458_s23, 0 }
  0x35   : > { %s804_s9 = sshll.u32 %s1135_s5, 8  ;;  %s164_s10 = scalar_lea.sflag [#allocation3], %s1135_s5 }
  0x36   : > { %s1141_s11 = scalar_lea.vmem [#allocation2], %s804_s9 }
  0x37   : > { %987 = dma.done.wait (%p1462_p6), %s164_s10, 4096  }
  0x38   : > { %989 = vsyncadd (%p1462_p6), %s164_s10, 4294963200  ;;  %v1148_v0 = vld [vmem:[%s1141_s11 + $0x80] sm:$0xff]  ;;  %v1151_v1 = vld [vmem:[%s1141_s11 + $0x88] sm:$0xff]  ;;  %v1013_v48 = vmov 0.0   ;;  %vm1014_vm0 = vmmov 0   ;;  %v313_v61 = vlaneseq  ;;  %vm324_vm1 = vcmask 130112  }
  0x39   : > { %v1154_v2 = vld [vmem:[%s1141_s11] sm:$0xff]  ;;  %v248_v3 = vadd.f32 %v1151_v1, %v1148_v0  ;;  %v1159_v4 = vld [vmem:[%s1141_s11 + $0x8] sm:$0xff]  ;;  %v1162_v5 = vld [vmem:[%s1141_s11 + $0x90] sm:$0xff]  ;;  %832 = vmatprep.subr.mxu0 %v1013_v48  ;;  %851 = vmatprep.subr.mxu1 %v1013_v48  ;;  %vm331_vm2 = vcmask 195712   ;;  %vm338_vm3 = vcmask 261312   ;;  %vm345_vm4 = vcmask 326912  }
  0x3a   : > { %v1165_v6 = vld [vmem:[%s1141_s11 + $0x98] sm:$0xff]  ;;  %v224_v7 = vadd.f32 %v1159_v4, %v1154_v2  ;;  %v1170_v8 = vld [vmem:[%s1141_s11 + $0x10] sm:$0xff]  ;;  %v1180_v12 = vld [vmem:[%s1141_s11 + $0xa0] sm:$0xff]  ;;  %848 = vmatprep.mubr.msk.f32.mxu0 %vm1014_vm0, %v1013_v48  ;;  %853 = vmatprep.mubr.msk.f32.mxu1 %vm1014_vm0, %v1013_v48  ;;  %vm352_vm5 = vcmask 392512   ;;  %vm359_vm6 = vcmask 458112   ;;  %vm366_vm7 = vcmask 523712  }
  0x3b   : > { %v1173_v9 = vld [vmem:[%s1141_s11 + $0x18] sm:$0xff]  ;;  %249 = vadd.xlane.f32.xlu1 %v248_v3  ;;  %v251_v10 = vadd.f32 %v1165_v6, %v1162_v5  ;;  %v1183_v13 = vld [vmem:[%s1141_s11 + $0xa8] sm:$0xff]  ;;  %v1186_v14 = vld [vmem:[%s1141_s11 + $0x20] sm:$0xff]  ;;  %v314_v3 = vand.u32 127, %v313_v61  ;;  %vm407_vm8 = vcmask 1041409   ;;  %vm409_vm9 = vcmask 523264  }
  0x3c   : > { %225 = vadd.xlane.f32.xlu0 %v224_v7  ;;  %v227_v11 = vadd.f32 %v1173_v9, %v1170_v8  ;;  %v1189_v15 = vld [vmem:[%s1141_s11 + $0x28] sm:$0xff]  ;;  %v254_v16 = vadd.f32 %v1183_v13, %v1180_v12  ;;  %v1196_v18 = vld [vmem:[%s1141_s11 + $0xb0] sm:$0xff]  ;;  %v1199_v19 = vld [vmem:[%s1141_s11 + $0xb8] sm:$0xff]  ;;  %vm494_vm10 = vcmask 1043456   ;;  %vm490_vm11 = vcmask 31744   ;;  %s1332_s6 = scalar_lea.vmem [#allocation5], %s804_s9 }
  0x3d   : > { %v230_v17 = vadd.f32 %v1189_v15, %v1186_v14  ;;  %1463 = vst [vmem:[#allocation8_spill] sm:$0xff] %v1199_v19  ;;  %v1202_v20 = vld [vmem:[%s1141_s11 + $0x30] sm:$0xff]  ;;  %v1205_v21 = vld [vmem:[%s1141_s11 + $0x38] sm:$0xff]  ;;  %v257_v22 = vadd.f32 %v1199_v19, %v1196_v18  ;;  %v1212_v24 = vld [vmem:[%s1141_s11 + $0xc0] sm:$0xff]  ;;  %s820_s9 = sshll.u32 %s1059_s16, 12  ;;  %s723_s7 = sshll.u32 %s1332_s6, 4  ;;  %s1397_s7 = int_to_ptr.vmem [resolvable:$true] %s723_s7 }
  0x3e   : > { %v233_v23 = vadd.f32 %v1205_v21, %v1202_v20  ;;  %v1215_v25 = vld [vmem:[%s1141_s11 + $0xc8] sm:$0xff]  ;;  %v1218_v26 = vld [vmem:[%s1141_s11 + $0x40] sm:$0xff]  ;;  %v1228_v30 = vld [vmem:[%s1141_s11 + $0xd0] sm:$0xff]  ;;  %s1395_s19 = scalar_lea.hbm %s1447_s3, %s820_s9  ;;  %s709_s16 = scalar_lea.sflag [#allocation4], %s1135_s5 }
  0x3f   : > { %252 = vadd.xlane.f32.xlu1 %v251_v10  ;;  %v1221_v27 = vld [vmem:[%s1141_s11 + $0x48] sm:$0xff]  ;;  %v260_v28 = vadd.f32 %v1215_v25, %v1212_v24  ;;  %1464 = vst [vmem:[#allocation9_spill] sm:$0xff] %v1228_v30  ;;  %v1231_v31 = vld [vmem:[%s1141_s11 + $0xd8] sm:$0xff]  ;;  %v1234_v32 = vld [vmem:[%s1141_s11 + $0x50] sm:$0xff]  ;;  %v1299_v10 = vshrl.u32 %v313_v61, 7  ;;  %s944_s20 = scalar_lea.vmem %s1397_s7, 4096 }
  0x40   : > { %228 = vadd.xlane.f32.xlu0 %v227_v11  ;;  %v236_v29 = vadd.f32 %v1221_v27, %v1218_v26  ;;  %1465 = vst [vmem:[#allocation10_spill] sm:$0xff] %v1231_v31  ;;  %v1237_v33 = vld [vmem:[%s1141_s11 + $0x58] sm:$0xff]  ;;  %v263_v34 = vadd.f32 %v1231_v31, %v1228_v30  ;;  %v1244_v36 = vld [vmem:[%s1141_s11 + $0xe0] sm:$0xff]  ;;  %v1247_v37 = vld [vmem:[%s1141_s11 + $0xe8] sm:$0xff]  ;;  %p945_p11 = scmp.ne.s32.totalorder %s1397_s7, %s944_s20  ;;  %p1477_p12 = scmp.ne.s32.totalorder %s1459_s24, 0 }
  0x41   : > { %v239_v35 = vadd.f32 %v1237_v33, %v1234_v32  ;;  %1466 = vst [vmem:[#allocation11_spill] sm:$0xff] %v1244_v36  ;;  %1467 = vst [vmem:[#allocation12_spill] sm:$0xff] %v1247_v37  ;;  %v1250_v38 = vld [vmem:[%s1141_s11 + $0x60] sm:$0xff]  ;;  %v1253_v39 = vld [vmem:[%s1141_s11 + $0x68] sm:$0xff]  ;;  %v266_v40 = vadd.f32 %v1247_v37, %v1244_v36  ;;  %s1015_s22 = smov [#allocation5]  }
  0x42   : > { %v242_v41 = vadd.f32 %v1253_v39, %v1250_v38  ;;  %v1260_v42 = vld [vmem:[%s1141_s11 + $0xf0] sm:$0xff]  ;;  %v1263_v43 = vld [vmem:[%s1141_s11 + $0xf8] sm:$0xff]  ;;  %v294_v51 = vld [vmem:[%s1445_s1 + $0x28] sm:$0xff]  ;;  %p946_p13 = pnand %p945_p11, %p1477_p12  ;;  %s948_s26 = sshll.u32 %s1015_s22, 4  ;;  %s949_s26 = int_to_ptr.vmem [resolvable:$false] %s948_s26 }
  0x43   : > { %255 = vadd.xlane.f32.xlu1 %v254_v16  ;;  %1468 = vst [vmem:[#allocation13_spill] sm:$0xff] %v1260_v42  ;;  %1469 = vst [vmem:[#allocation14_spill] sm:$0xff] %v1263_v43  ;;  %v1266_v44 = vld [vmem:[%s1141_s11 + $0x70] sm:$0xff]  ;;  %v1269_v45 = vld [vmem:[%s1141_s11 + $0x78] sm:$0xff]  ;;  %v269_v46 = vadd.f32 %v1263_v43, %v1260_v42  ;;  %v319_v16 = vadd.s32 4294967288, %v314_v3  ;;  %s950_s27 = scalar_lea.vmem %s949_s26, 8192  ;;  %p951_p5 = scmp.lt.s32.totalorder %s1397_s7, %s949_s26 }
  0x44   : > { %231 = vadd.xlane.f32.xlu0 %v230_v17  ;;  %v245_v47 = vadd.f32 %v1269_v45, %v1266_v44  ;;  %v296_v49 = vld [vmem:[%s1445_s1 + $0x38] sm:$0xff]  ;;  %v295_v50 = vld [vmem:[%s1445_s1 + $0x30] sm:$0xff]  ;;  %v293_v52 = vld [vmem:[%s1445_s1 + $0x20] sm:$0xff]  ;;  %v326_v17 = vadd.s32 4294967280, %v314_v3  ;;  %p947_p4 = pneg %p946_p13  ;;  %p952_p7 = scmp.lt.s32.totalorder %s950_s27, %s944_s20 }
  0x45   : > { %833 = vmatpush3.msra.mxu0 %v296_v49  ;;  %v292_v53 = vld [vmem:[%s1445_s1 + $0x18] sm:$0xff]  ;;  %v291_v54 = vld [vmem:[%s1445_s1 + $0x10] sm:$0xff]  ;;  %v290_v55 = vld [vmem:[%s1445_s1 + $0x8] sm:$0xff] }
  0x46   : > { %834 = vmatprep.subr.mxu0 %v1013_v48  ;;  %v289_v56 = vld [vmem:[%s1445_s1] sm:$0xff]  ;;  %p953_p8 = por %p952_p7, %p951_p5 }
  0x47   : > { %258 = vadd.xlane.f32.xlu1 %v257_v22  ;;  %835 = vmatpush3.msra.mxu0 %v295_v50  ;;  %v333_v22 = vadd.s32 4294967272, %v314_v3 }
  0x48   : > { %234 = vadd.xlane.f32.xlu0 %v233_v23  ;;  %836 = vmatprep.subr.mxu0 %v1013_v48  ;;  %v340_v23 = vadd.s32 4294967264, %v314_v3  ;;  %p954_p10 = pnand %p953_p8, %p947_p4 }
  0x49   : > { %837 = vmatpush3.msra.mxu0 %v294_v51 }
  0x4a   : > { %838 = vmatprep.subr.mxu0 %v1013_v48  ;;  %v343_v49 = vsub.s32 %v340_v23, %v1299_v10  ;;  %v361_v23 = vadd.s32 4294967240, %v314_v3 }
  0x4b   : > { %261 = vadd.xlane.f32.xlu1 %v260_v28  ;;  %839 = vmatpush3.msra.mxu0 %v293_v52 }
  0x4c   : > { %237 = vadd.xlane.f32.xlu0 %v236_v29  ;;  %840 = vmatprep.subr.mxu0 %v1013_v48  ;;  %v347_v29 = vadd.s32 4294967256, %v314_v3 }
  0x4d   : > { %841 = vmatpush3.msra.mxu0 %v292_v53 }
  0x4e   : > { %842 = vmatprep.subr.mxu0 %v1013_v48  ;;  %v350_v52 = vsub.s32 %v347_v29, %v1299_v10 }
  0x4f   : > { %264 = vadd.xlane.f32.xlu1 %v263_v34  ;;  %843 = vmatpush3.msra.mxu0 %v291_v54  ;;  %v317_v34 = vsub.s32 %v314_v3, %v1299_v10 }
  0x50   : > { %240 = vadd.xlane.f32.xlu0 %v239_v35  ;;  %844 = vmatprep.subr.mxu0 %v1013_v48 }
  0x51   : > { %845 = vmatpush3.msra.mxu0 %v290_v55 }
  0x52   : > { %846 = vmatprep.subr.mxu0 %v1013_v48  ;;  %v336_v48 = vsub.s32 %v333_v22, %v1299_v10 }
  0x53   : > { %267 = vadd.xlane.f32.xlu1 %v266_v40  ;;  %847 = vmatpush3.msra.mxu0 %v289_v56  ;;  %v322_v40 = vsub.s32 %v319_v16, %v1299_v10 }
  0x54   : > { %243 = vadd.xlane.f32.xlu0 %v242_v41  ;;  %v329_v41 = vsub.s32 %v326_v17, %v1299_v10 }
  0x57   : > { %270 = vadd.xlane.f32.xlu1 %v269_v46  ;;  %v354_v46 = vadd.s32 4294967248, %v314_v3  ;;  %v364_v3 = vsub.s32 %v361_v23, %v1299_v10 }
  0x58   : > { %246 = vadd.xlane.f32.xlu0 %v245_v47 }
  0xc4   : > { %v250_v57 = vpop.xlane.xlu1 %249 }
  0xc5   : > { %v226_v58 = vpop.xlane.xlu0 %225  ;;  %v281_v54 = vmul.f32 0.00390625, %v250_v57 }
  0xc6   : > { %v273_v16 = vmul.f32 0.00390625, %v226_v58 }
  0xc7   : > { %v371_v37 = vrot.slane %v281_v54, %v317_v34 }
  0xc8   : > { %v253_v59 = vpop.xlane.xlu1 %252  ;;  %v318_v19 = vrot.slane %v273_v16, %v317_v34 }
  0xc9   : > { %v229_v60 = vpop.xlane.xlu0 %228  ;;  %v282_v47 = vmul.f32 0.00390625, %v253_v59  ;;  %v357_v59 = vsub.s32 %v354_v46, %v1299_v10 }
  0xca   : > { %v274_v50 = vmul.f32 0.00390625, %v229_v60 }
  0xcb   : > { %v375_v22 = vrot.slane %v282_v47, %v322_v40 }
  0xcc   : > { %v256_v62 = vpop.xlane.xlu1 %255  ;;  %v323_v60 = vrot.slane %v274_v50, %v322_v40 }
  0xcd   : > { %v232_v63 = vpop.xlane.xlu0 %231  ;;  %v283_v51 = vmul.f32 0.00390625, %v256_v62  ;;  %v376_v46 = vsel %vm324_vm1, %v375_v22, %v371_v37  ;;  %v489_v22 = vld [vmem:[%s1446_s2] sm:$0xf] }
  0xce   : > { %v275_v55 = vmul.f32 0.00390625, %v232_v63  ;;  %v325_v40 = vsel %vm324_vm1, %v323_v60, %v318_v19  ;;  %852 = vmatpush3.msk.msra.mxu1 %vm494_vm10, %v489_v22  ;;  %v1472_v22 = vld [vmem:[#allocation12_spill] sm:$0xff] }
  0xcf   : > { %v380_v62 = vrot.slane %v283_v51, %v329_v41 }
  0xd0   : > { %v259_v7 = vpop.xlane.xlu1 %258  ;;  %v330_v57 = vrot.slane %v275_v55, %v329_v41 }
  0xd1   : > { %v235_v11 = vpop.xlane.xlu0 %234  ;;  %v284_v56 = vmul.f32 0.00390625, %v259_v7  ;;  %v381_v50 = vsel %vm331_vm2, %v380_v62, %v376_v46 }
  0xd2   : > { %v276_v17 = vmul.f32 0.00390625, %v235_v11  ;;  %v332_v54 = vsel %vm331_vm2, %v330_v57, %v325_v40 }
  0xd3   : > { %v385_v63 = vrot.slane %v284_v56, %v336_v48 }
  0xd4   : > { %v262_v28 = vpop.xlane.xlu1 %261  ;;  %v337_v58 = vrot.slane %v276_v17, %v336_v48 }
  0xd5   : > { %v238_v35 = vpop.xlane.xlu0 %237  ;;  %v285_v43 = vmul.f32 0.00390625, %v262_v28  ;;  %v386_v34 = vsel %vm338_vm3, %v385_v63, %v381_v50  ;;  %v611_v50 = vsub.s32 1, %v1299_v10 }
  0xd6   : > { %v277_v42 = vmul.f32 0.00390625, %v238_v35  ;;  %v339_v37 = vsel %vm338_vm3, %v337_v58, %v332_v54 }
  0xd7   : > { %v390_v11 = vrot.slane %v285_v43, %v343_v49 }
  0xd8   : > { %v265_v53 = vpop.xlane.xlu1 %264  ;;  %v344_v47 = vrot.slane %v277_v42, %v343_v49 }
  0xd9   : > { %v241_v61 = vpop.xlane.xlu0 %240  ;;  %v286_v31 = vmul.f32 0.00390625, %v265_v53 }
  0xda   : > { %v278_v30 = vmul.f32 0.00390625, %v241_v61  ;;  %v346_v19 = vsel %vm345_vm4, %v344_v47, %v339_v37 }
  0xdb   : > { %v395_v35 = vrot.slane %v286_v31, %v350_v52  ;;  %v391_v31 = vsel %vm345_vm4, %v390_v11, %v386_v34 }
  0xdc   : > { %v268_v29 = vpop.xlane.xlu1 %267  ;;  %v351_v51 = vrot.slane %v278_v30, %v350_v52 }
  0xdd   : > { %v287_v7 = vmul.f32 0.00390625, %v268_v29  ;;  %v244_v36 = vpop.xlane.xlu0 %243  ;;  %v396_v49 = vsel %vm352_vm5, %v395_v35, %v391_v31  ;;  %v576_v35 = vsub.s32 0, %v1299_v10 }
  0xde   : > { %v279_v28 = vmul.f32 0.00390625, %v244_v36  ;;  %v353_v52 = vsel %vm352_vm5, %v351_v51, %v346_v19 }
  0xdf   : > { %v400_v53 = vrot.slane %v287_v7, %v357_v59 }
  0xe0   : > { %v271_v41 = vpop.xlane.xlu1 %270  ;;  %v358_v48 = vrot.slane %v279_v28, %v357_v59 }
  0xe1   : > { %v288_v43 = vmul.f32 0.00390625, %v271_v41  ;;  %v247_v36 = vpop.xlane.xlu0 %246  ;;  %v401_v55 = vsel %vm359_vm6, %v400_v53, %v396_v49 }
  0xe2   : > { %v280_v42 = vmul.f32 0.00390625, %v247_v36  ;;  %v360_v61 = vsel %vm359_vm6, %v358_v48, %v353_v52 }
  0xe3   : > { %v405_v30 = vrot.slane %v288_v43, %v364_v3 }
  0xe4   : > { %v365_v56 = vrot.slane %v280_v42, %v364_v3 }
  0xe5   : > { %v406_v16 = vsel %vm366_vm7, %v405_v30, %v401_v55 }
  0xe6   : > { %v367_v17 = vsel %vm366_vm7, %v365_v56, %v360_v61 }
  0xe7   : > { %v408_v59 = vsel %vm407_vm8, %v406_v16, %v367_v17  ;;  %v1470_v16 = vld [vmem:[#allocation8_spill] sm:$0xff] }
  0xe8   : > { %849 = vmatmul.mubr.msk.f32.vlgmr.msra.gmra.mxu0 %vm409_vm9, %v408_v59 }
 0x1a8   : > { %v478_v23 = vpop.f32.mrf.mxu0 }
 0x1a9   : > { %v807_v60 = vmul.f32 -1.442695, %v478_v23 }
 0x1aa   : > { %v850_v62 = vpop.f32.mrf.mxu0 }
 0x1ab   : > { %908 = vpow2.f32 %v807_v60  ;;  %v1474_v62 = vld [vmem:[#allocation10_spill] sm:$0xff] }
 0x1b8   : > { %v909_v29 = vpop.eup %908 }
 0x1b9   : > { %v485_v57 = vadd.f32 1.0, %v909_v29 }
 0x1bb   : > { %910 = vrcp.f32 %v485_v57  ;;  %v1475_v57 = vld [vmem:[#allocation13_spill] sm:$0xff] }
 0x1c8   : > { %v911_v63 = vpop.eup %910 }
 0x1c9   : > { %v488_v7 = vmul.f32 %v911_v63, %v478_v23  ;;  %v1473_v23 = vld [vmem:[#allocation9_spill] sm:$0xff] }
 0x1cb   : > { %854 = vmatmul.mubr.msk.f32.vlgmr.msra.gmra.mxu1 %vm490_vm11, %v488_v7  ;;  %v1476_v7 = vld [vmem:[#allocation14_spill] sm:$0xff] }
 0x28b   : > { %v564_v58 = vpop.f32.mrf.mxu1 }
 0x28c   : > { %v810_v11 = vmul.f32 -1.442695, %v564_v58 }
 0x28d   : > { %v855_v28 = vpop.f32.mrf.mxu1 }
 0x28e   : > { %912 = vpow2.f32 %v810_v11 }
 0x29b   : > { %v913_v46 = vpop.eup %912 }
 0x29c   : > { %v571_v47 = vadd.f32 1.0, %v913_v46 }
 0x29e   : > { %914 = vrcp.f32 %v571_v47 }
 0x2ab   : > { %v915_v3 = vpop.eup %914 }
 0x2ac   : > { %v577_v40 = vrot.slane %v915_v3, %v576_v35  ;;  %v612_v51 = vrot.slane %v915_v3, %v611_v50 }
 0x2ae   : > { %583 = vbcast.lane.b32.xlu1 %v577_v40, 264  ;;  %579 = vbcast.lane.b32.xlu0 %v577_v40, 256 }
 0x2b2   : > { %587 = vbcast.lane.b32.xlu1 %v577_v40, 272  ;;  %595 = vbcast.lane.b32.xlu0 %v577_v40, 288 }
 0x2b6   : > { %591 = vbcast.lane.b32.xlu1 %v577_v40, 280  ;;  %603 = vbcast.lane.b32.xlu0 %v577_v40, 304 }
 0x2ba   : > { %599 = vbcast.lane.b32.xlu1 %v577_v40, 296  ;;  %614 = vbcast.lane.b32.xlu0 %v612_v51, 256 }
 0x2be   : > { %607 = vbcast.lane.b32.xlu1 %v577_v40, 312  ;;  %622 = vbcast.lane.b32.xlu0 %v612_v51, 272 }
 0x2c2   : > { %618 = vbcast.lane.b32.xlu1 %v612_v51, 264  ;;  %630 = vbcast.lane.b32.xlu0 %v612_v51, 288 }
 0x2c6   : > { %626 = vbcast.lane.b32.xlu1 %v612_v51, 280  ;;  %638 = vbcast.lane.b32.xlu0 %v612_v51, 304 }
 0x2ca   : > { %634 = vbcast.lane.b32.xlu1 %v612_v51, 296 }
 0x2ce   : > { %642 = vbcast.lane.b32.xlu1 %v612_v51, 312 }
 0x320   : > { %v584_v53 = vpop.permute.xlu1 %583  ;;  %v580_v41 = vpop.permute.xlu0 %579 }
 0x321   : > { %v646_v54 = vmul.f32 %v584_v53, %v1170_v8  ;;  %v647_v10 = vmul.f32 %v584_v53, %v1173_v9  ;;  %v644_v34 = vmul.f32 %v580_v41, %v1154_v2  ;;  %v645_v48 = vmul.f32 %v580_v41, %v1159_v4 }
 0x323   : > { %678 = vst [vmem:[%s1332_s6 + $0x10] sm:$0xff] %v646_v54  ;;  %679 = vst [vmem:[%s1332_s6 + $0x18] sm:$0xff] %v647_v10 }
 0x324   : > { %676 = vst [vmem:[%s1332_s6] sm:$0xff] %v644_v34  ;;  %677 = vst [vmem:[%s1332_s6 + $0x8] sm:$0xff] %v645_v48  ;;  %v588_v8 = vpop.permute.xlu1 %587  ;;  %v596_v2 = vpop.permute.xlu0 %595 }
 0x325   : > { %v648_v4 = vmul.f32 %v588_v8, %v1186_v14  ;;  %v649_v9 = vmul.f32 %v588_v8, %v1189_v15  ;;  %v652_v43 = vmul.f32 %v596_v2, %v1218_v26  ;;  %v653_v36 = vmul.f32 %v596_v2, %v1221_v27 }
 0x327   : > { %680 = vst [vmem:[%s1332_s6 + $0x20] sm:$0xff] %v648_v4  ;;  %681 = vst [vmem:[%s1332_s6 + $0x28] sm:$0xff] %v649_v9 }
 0x328   : > { %684 = vst [vmem:[%s1332_s6 + $0x40] sm:$0xff] %v652_v43  ;;  %685 = vst [vmem:[%s1332_s6 + $0x48] sm:$0xff] %v653_v36  ;;  %v592_v37 = vpop.permute.xlu1 %591  ;;  %v604_v31 = vpop.permute.xlu0 %603 }
 0x329   : > { %v650_v42 = vmul.f32 %v592_v37, %v1202_v20  ;;  %v651_v14 = vmul.f32 %v592_v37, %v1205_v21  ;;  %v656_v15 = vmul.f32 %v604_v31, %v1250_v38  ;;  %v657_v26 = vmul.f32 %v604_v31, %v1253_v39 }
 0x32b   : > { %682 = vst [vmem:[%s1332_s6 + $0x30] sm:$0xff] %v650_v42  ;;  %683 = vst [vmem:[%s1332_s6 + $0x38] sm:$0xff] %v651_v14 }
 0x32c   : > { %688 = vst [vmem:[%s1332_s6 + $0x60] sm:$0xff] %v656_v15  ;;  %689 = vst [vmem:[%s1332_s6 + $0x68] sm:$0xff] %v657_v26  ;;  %v600_v27 = vpop.permute.xlu1 %599  ;;  %v615_v19 = vpop.permute.xlu0 %614 }
 0x32d   : > { %v654_v49 = vmul.f32 %v600_v27, %v1234_v32  ;;  %v655_v20 = vmul.f32 %v600_v27, %v1237_v33  ;;  %v660_v21 = vmul.f32 %v615_v19, %v1148_v0  ;;  %v661_v38 = vmul.f32 %v615_v19, %v1151_v1 }
 0x32f   : > { %686 = vst [vmem:[%s1332_s6 + $0x50] sm:$0xff] %v654_v49  ;;  %687 = vst [vmem:[%s1332_s6 + $0x58] sm:$0xff] %v655_v20 }
 0x330   : > { %692 = vst [vmem:[%s1332_s6 + $0x80] sm:$0xff] %v660_v21  ;;  %693 = vst [vmem:[%s1332_s6 + $0x88] sm:$0xff] %v661_v38  ;;  %v608_v39 = vpop.permute.xlu1 %607  ;;  %v623_v30 = vpop.permute.xlu0 %622 }
 0x331   : > { %v658_v52 = vmul.f32 %v608_v39, %v1266_v44  ;;  %v659_v32 = vmul.f32 %v608_v39, %v1269_v45  ;;  %v664_v33 = vmul.f32 %v623_v30, %v1180_v12  ;;  %v665_v0 = vmul.f32 %v623_v30, %v1183_v13 }
 0x333   : > { %690 = vst [vmem:[%s1332_s6 + $0x70] sm:$0xff] %v658_v52  ;;  %691 = vst [vmem:[%s1332_s6 + $0x78] sm:$0xff] %v659_v32 }
 0x334   : > { %696 = vst [vmem:[%s1332_s6 + $0xa0] sm:$0xff] %v664_v33  ;;  %697 = vst [vmem:[%s1332_s6 + $0xa8] sm:$0xff] %v665_v0  ;;  %v619_v1 = vpop.permute.xlu1 %618  ;;  %v631_v55 = vpop.permute.xlu0 %630 }
 0x335   : > { %v662_v56 = vmul.f32 %v619_v1, %v1162_v5  ;;  %v663_v44 = vmul.f32 %v619_v1, %v1165_v6  ;;  %v668_v45 = vmul.f32 %v631_v55, %v1212_v24  ;;  %v669_v12 = vmul.f32 %v631_v55, %v1215_v25  ;;  %v1471_v6 = vld [vmem:[#allocation11_spill] sm:$0xff] }
 0x337   : > { %694 = vst [vmem:[%s1332_s6 + $0x90] sm:$0xff] %v662_v56  ;;  %695 = vst [vmem:[%s1332_s6 + $0x98] sm:$0xff] %v663_v44 }
 0x338   : > { %700 = vst [vmem:[%s1332_s6 + $0xc0] sm:$0xff] %v668_v45  ;;  %701 = vst [vmem:[%s1332_s6 + $0xc8] sm:$0xff] %v669_v12  ;;  %v627_v13 = vpop.permute.xlu1 %626  ;;  %v639_v61 = vpop.permute.xlu0 %638 }
 0x339   : > { %v666_v5 = vmul.f32 %v627_v13, %v1196_v18  ;;  %v667_v17 = vmul.f32 %v627_v13, %v1470_v16  ;;  %v672_v59 = vmul.f32 %v639_v61, %v1471_v6  ;;  %v673_v24 = vmul.f32 %v639_v61, %v1472_v22 }
 0x33b   : > { %698 = vst [vmem:[%s1332_s6 + $0xb0] sm:$0xff] %v666_v5  ;;  %699 = vst [vmem:[%s1332_s6 + $0xb8] sm:$0xff] %v667_v17 }
 0x33c   : > { %704 = vst [vmem:[%s1332_s6 + $0xe0] sm:$0xff] %v672_v59  ;;  %705 = vst [vmem:[%s1332_s6 + $0xe8] sm:$0xff] %v673_v24  ;;  %v635_v25 = vpop.permute.xlu1 %634 }
 0x33d   : > { %v670_v60 = vmul.f32 %v635_v25, %v1473_v23  ;;  %v671_v29 = vmul.f32 %v635_v25, %v1474_v62 }
 0x33f   : > { %702 = vst [vmem:[%s1332_s6 + $0xd0] sm:$0xff] %v670_v60  ;;  %703 = vst [vmem:[%s1332_s6 + $0xd8] sm:$0xff] %v671_v29 }
 0x340   : > { %v643_v18 = vpop.permute.xlu1 %642 }
 0x341   : > { %v674_v63 = vmul.f32 %v643_v18, %v1475_v57  ;;  %v675_v58 = vmul.f32 %v643_v18, %v1476_v7 }
 0x343   : > { %706 = vst [vmem:[%s1332_s6 + $0xf0] sm:$0xff] %v674_v63  ;;  %707 = vst [vmem:[%s1332_s6 + $0xf8] sm:$0xff] %v675_v58 }
 0x344   : > { %957 = shalt.err (!%p954_p10)
}
 0x345   : > { %s958_s28 = scalar_lea.hbm %s1395_s19, 4096  ;;  %s962_s10 = scalar_lea.hbm %s1447_s3, 8192 }
 0x346   : > { %p959_p0 = scmp.ne.s32.totalorder %s1395_s19, %s958_s28  ;;  %p963_p1 = scmp.lt.s32.totalorder %s1395_s19, %s1447_s3 }
 0x347   : > { %p964_p3 = scmp.lt.s32.totalorder %s962_s10, %s958_s28 }
 0x348   : > { %p960_p2 = pnand %p959_p0, %p1477_p12 }
 0x349   : > { %p965_p6 = por %p964_p3, %p963_p1 }
 0x34a   : > { %p961_p9 = pneg %p960_p2 }
 0x34c   : > { %p966_p11 = pnand %p965_p6, %p961_p9 }
 0x34e   : > { %969 = shalt.err (!%p966_p11)
}
 0x34f   : > { %s1016_s4 = smov 256   ;;  %s1017_s6 = smov 16  }
 0x350   : > { %858 = dma.vmem_to_hbm [thread:$0]  (%p1477_p12), %s1397_s7, 4096, %s1395_s19, %s709_s16, %s1016_s4, %s1016_s4, %s1017_s6  }
 0x351 PF: > { %s738_s9 = sand.u32 1, %s996_s12   ;;  %p1478_p13 = scmp.ne.s32.totalorder %s1460_s25, 0 }
 0x352   : > { %p1479_p4 = scmp.ge.s32.totalorder %s1008_s15, 2  ;;  %s739_s8 = scalar_lea.sflag [#allocation4], %s738_s9 }
 0x354   : > { %p865_p5 = pnand %p1479_p4, %p1478_p13 }
 0x356   : > { %p866_p7 = pneg %p865_p5 }
 0x358   : > { %991 = dma.done.wait (%p866_p7), %s739_s8, 4096  }
 0x359   : > { %993 = vsyncadd (%p866_p7), %s739_s8, 4294963200  ;;  %p16_p8 = scmp.ge.s32.totalorder %s1063_s18, 4   ;;  %s1480_s12 = smov %s1000_s13 }
 0x35a   : > { %s1481_s13 = smov %s1004_s14  ;;  %s1482_s14 = smov %s1075_s21 }
 0x35b   : > { %s1483_s15 = smov %s1063_s18  ;;  %18 = sbr.rel (!%p16_p8) target bundleno = 5 (0x5), region = 77 }
 0x360   :  { %744 = vsyncpa [#allocation3], 1 }
 0x361   :  { %746 = vsyncpa [#allocation3 + $0x1], 1 }
 0x362   :  { %747 = vsyncpa [#allocation4], 1 }
 0x363   :  { %749 = vsyncpa [#allocation4 + $0x1], 1 }

</bundles_post_ra>
